<compile_context>
chip_gen: v6e
topology: v6e:2x2x1
jax: 0.10.0
libtpu: 0.0.40
codegen_flags: <defaults>
</compile_context>

<pallas_src>
import functools

import jax
import jax.numpy as jnp
from jax.experimental import pallas as pl
from jax.experimental.pallas import tpu as pltpu

DST = 224            # cv2.resize target (224, 224), as in draw_features
CB_MAX = 32          # max channels per grid step (safe on v7x 64 MiB VMEM,
                     # big enough for near-roofline output DMAs on v5e/v6e)
SUBLANE_BF16 = 16    # bf16 sublane tile; H is padded to a multiple of this


def _resize_matrix(dst: int, src: int) -> jnp.ndarray:
    """Row-interpolation matrix M (dst, src): M @ v bilinearly resamples v.

    Uses cv2 INTER_LINEAR half-pixel-center convention with edge clamping.
    """
    scale = src / dst
    x = (jnp.arange(dst, dtype=jnp.float32) + 0.5) * scale - 0.5
    x0f = jnp.floor(x)
    frac = x - x0f
    i0 = jnp.clip(x0f.astype(jnp.int32), 0, src - 1)
    i1 = jnp.clip(x0f.astype(jnp.int32) + 1, 0, src - 1)
    # clamp weights at the borders (cv2 replicates edge pixels)
    frac = jnp.where(x < 0.0, 0.0, frac)
    frac = jnp.where(x > src - 1, 1.0, frac)
    rows = jnp.arange(dst)
    m = jnp.zeros((dst, src), dtype=jnp.float32)
    m = m.at[rows, i0].add(1.0 - frac)
    m = m.at[rows, i1].add(frac)
    return m


def _choose_channel_blocking(C: int):
    """Return (cb, num_blocks) with cb <= CB_MAX, num_blocks >= 2 when C >= 2,
    and minimal channel padding (num_blocks * cb - C < num_blocks)."""
    if C <= 1:
        return 1, 1
    num_blocks = max(2, -(-C // CB_MAX))   # >=2 so v7x's two TCs both work
    cb = -(-C // num_blocks)
    return cb, num_blocks


def _resize_kernel(img_ref, ry_ref, rxt_ref, out_ref, *, cb: int, hp: int):
    # img_ref: (cb*hp, W)      bf16 -- cb channels of x[0], rows zero-padded to hp
    # ry_ref : (DST, hp)       bf16 -- row interpolation matrix (zero-padded cols)
    # rxt_ref: (W, DST)        bf16 -- column interpolation matrix, pre-transposed
    # out_ref: (cb, DST, DST)  bf16
    #
    # Stage 1: one wide matmul over the whole channel block; N = DST = 224 is
    # lane-dense.  f32 accumulation on the MXU.
    t_all = jnp.dot(img_ref[...], rxt_ref[...],
                    preferred_element_type=jnp.float32)        # (cb*hp, DST) f32
    t_bf = t_all.astype(jnp.bfloat16)                          # cast once for stage 2
    ry = ry_ref[...]                                           # (DST, hp) bf16

    # Stage 2: per-channel (DST, hp) @ (hp, DST); cb is small -> static unroll.
    # hp is a multiple of 16, so every slice starts on a bf16 sublane tile
    # boundary (no relayout copies).
    for c in range(cb):
        t_c = t_bf[c * hp:(c + 1) * hp, :]                     # (hp, DST)
        out_ref[c] = jnp.dot(ry, t_c,
                             preferred_element_type=jnp.float32
                             ).astype(out_ref.dtype)


def vis_block_forward(x: jnp.ndarray) -> jnp.ndarray:
    """Pallas implementation of VisBlock.forward's tensor hot path.

    x: (N, C, H, W) float32 (NCHW, as in PyTorch).
    Returns (C, 224, 224) bfloat16: bilinearly-resized channels of batch
    element 0, i.e. the stack of images draw_features would render/save.
    NOTE: output is intentionally bfloat16 (visualization-grade precision) to
    halve HBM writeback, which dominates this kernel's runtime.
    """
    # TODO(synk): directory creation, plt.imshow/imsave ('jet' colormap) and
    # JPEG writing are host-side I/O with no Pallas equivalent; not performed.
    assert x.ndim == 4
    _, C, H, W = x.shape

    cb, num_blocks = _choose_channel_blocking(C)
    C_pad = cb * num_blocks
    H_pad = -(-H // SUBLANE_BF16) * SUBLANE_BF16

    # Zero-pad channels (to a multiple of cb) and rows (to the bf16 sublane
    # tile); the matching zero columns appended to Ry make the math identical.
    x0 = jnp.pad(x[0].astype(jnp.float32),
                 ((0, C_pad - C), (0, H_pad - H), (0, 0)))      # (C_pad, H_pad, W)
    x2d = x0.astype(jnp.bfloat16).reshape(C_pad * H_pad, W)     # (C_pad*H_pad, W)

    ry = jnp.pad(_resize_matrix(DST, H),
                 ((0, 0), (0, H_pad - H))).astype(jnp.bfloat16)  # (DST, H_pad)
    rxt = _resize_matrix(DST, W).T.astype(jnp.bfloat16)          # (W, DST)

    flops = 2 * C_pad * H_pad * DST * (W + DST)
    bytes_accessed = (C_pad * H_pad * W * 2 + DST * H_pad * 2
                      + W * DST * 2 + C_pad * DST * DST * 2)

    kernel = functools.partial(_resize_kernel, cb=cb, hp=H_pad)
    out = pl.pallas_call(
        kernel,
        out_shape=jax.ShapeDtypeStruct((C_pad, DST, DST), jnp.bfloat16),
        grid=(num_blocks,),
        in_specs=[
            pl.BlockSpec((cb * H_pad, W), lambda c: (c, 0)),
            pl.BlockSpec((DST, H_pad), lambda c: (0, 0)),
            pl.BlockSpec((W, DST), lambda c: (0, 0)),
        ],
        out_specs=pl.BlockSpec((cb, DST, DST), lambda c: (c, 0, 0)),
        compiler_params=pltpu.CompilerParams(
            dimension_semantics=("parallel",),
            vmem_limit_bytes=48 * 1024 * 1024,
        ),
        cost_estimate=pl.CostEstimate(
            flops=flops, transcendentals=0, bytes_accessed=bytes_accessed),
    )(x2d, ry, rxt)
    return out[:C]


def _reference_resize_f32(x: jnp.ndarray) -> jnp.ndarray:
    """Pure-JAX f32 reference of the same bilinear resize."""
    _, C, H, W = x.shape
    ry = _resize_matrix(DST, H)          # (DST, H)
    rx = _resize_matrix(DST, W)          # (DST, W)
    x0 = x[0].astype(jnp.float32)
    return jnp.einsum("dh,chw,kw->cdk", ry, x0, rx)


if __name__ == "__main__":
    key = jax.random.PRNGKey(0)
    # Small NCHW feature map consistent with the module's expected input.
    x = jax.random.normal(key, (2, 4, 16, 16), dtype=jnp.float32)

    out = vis_block_forward(x)
    out = jax.block_until_ready(out)
    assert out.shape == (4, DST, DST)
    assert out.dtype == jnp.bfloat16

    # bf16 operands + bf16 output => compare against the f32 reference with a
    # visualization-grade tolerance (|x| <~ 4.5, two bf16 matmul stages plus
    # bf16 output quantization => abs err <~ 0.05).
    ref = _reference_resize_f32(x)
    err = float(jnp.max(jnp.abs(out.astype(jnp.float32) - ref)))
    assert err < 8e-2, f"max abs error vs f32 reference too large: {err}"

    print("KERNEL_OK")
</pallas_src>

<mosaic_0001>
module attributes {stable_mosaic.version = 11 : i64} {
  func.func @_resize_kernel(%arg0: i32, %arg1: memref<32x16xbf16, #tpu.memory_space<vmem>>, %arg2: memref<224x16xbf16, #tpu.memory_space<vmem>>, %arg3: memref<16x224xbf16, #tpu.memory_space<vmem>>, %arg4: memref<2x224x224xbf16, #tpu.memory_space<vmem>>) attributes {dimension_semantics = [#tpu.dimension_semantics<parallel>], iteration_bounds = array<i64: 2>, scalar_prefetch = 0 : i64, scratch_operands = 0 : i64, tpu.core_type = #tpu.core_type<tc>, window_params = [{transform_indices = @transform_0, window_bounds = array<i64: 32, 16>}, {pipeline_mode = #tpu.pipeline_mode<synchronous>, transform_indices = @transform_1, window_bounds = array<i64: 224, 16>}, {pipeline_mode = #tpu.pipeline_mode<synchronous>, transform_indices = @transform_2, window_bounds = array<i64: 16, 224>}, {transform_indices = @transform_3, window_bounds = array<i64: 2, 224, 224>}]} {
    %c0 = arith.constant 0 : index
    %c0_0 = arith.constant 0 : index
    %0 = vector.load %arg1[%c0, %c0_0] : memref<32x16xbf16, #tpu.memory_space<vmem>>, vector<32x16xbf16>
    %c0_1 = arith.constant 0 : index
    %c0_2 = arith.constant 0 : index
    %1 = vector.load %arg3[%c0_1, %c0_2] : memref<16x224xbf16, #tpu.memory_space<vmem>>, vector<16x224xbf16>
    %cst = arith.constant dense<0.000000e+00> : vector<32x224xf32>
    %2 = tpu.matmul %0, %1, %cst {dimension_numbers = #tpu.dot_dimension_numbers<[1], [0], [0], [1], [0, 0, 1, 1], [], []>} : vector<32x16xbf16>, vector<16x224xbf16>, vector<32x224xf32> -> vector<32x224xf32>
    %3 = arith.truncf %2 : vector<32x224xf32> to vector<32x224xbf16>
    %c0_3 = arith.constant 0 : index
    %c0_4 = arith.constant 0 : index
    %4 = vector.load %arg2[%c0_3, %c0_4] : memref<224x16xbf16, #tpu.memory_space<vmem>>, vector<224x16xbf16>
    %5 = vector.extract_strided_slice %3 {offsets = [0, 0], sizes = [16, 224], strides = [1, 1]} : vector<32x224xbf16> to vector<16x224xbf16>
    %cst_5 = arith.constant dense<0.000000e+00> : vector<224x224xf32>
    %6 = tpu.matmul %4, %5, %cst_5 {dimension_numbers = #tpu.dot_dimension_numbers<[1], [0], [0], [1], [0, 0, 1, 1], [], []>} : vector<224x16xbf16>, vector<16x224xbf16>, vector<224x224xf32> -> vector<224x224xf32>
    %7 = arith.truncf %6 : vector<224x224xf32> to vector<224x224xbf16>
    %c0_6 = arith.constant 0 : index
    %c0_7 = arith.constant 0 : index
    %c0_8 = arith.constant 0 : index
    %8 = vector.load %arg4[%c0_6, %c0_7, %c0_8] : memref<2x224x224xbf16, #tpu.memory_space<vmem>>, vector<1x224x224xbf16>
    %9 = vector.shape_cast %8 : vector<1x224x224xbf16> to vector<224x224xbf16>
    %10 = vector.shape_cast %7 : vector<224x224xbf16> to vector<1x224x224xbf16>
    tpu.vector_store %arg4[%c0_6, %c0_7, %c0_8], %10 {strides = array<i32>} : memref<2x224x224xbf16, #tpu.memory_space<vmem>>, vector<1x224x224xbf16>,
    %11 = vector.extract_strided_slice %3 {offsets = [16, 0], sizes = [16, 224], strides = [1, 1]} : vector<32x224xbf16> to vector<16x224xbf16>
    %cst_9 = arith.constant dense<0.000000e+00> : vector<224x224xf32>
    %12 = tpu.matmul %4, %11, %cst_9 {dimension_numbers = #tpu.dot_dimension_numbers<[1], [0], [0], [1], [0, 0, 1, 1], [], []>} : vector<224x16xbf16>, vector<16x224xbf16>, vector<224x224xf32> -> vector<224x224xf32>
    %13 = arith.truncf %12 : vector<224x224xf32> to vector<224x224xbf16>
    %c1 = arith.constant 1 : index
    %c0_10 = arith.constant 0 : index
    %c0_11 = arith.constant 0 : index
    %14 = vector.load %arg4[%c1, %c0_10, %c0_11] : memref<2x224x224xbf16, #tpu.memory_space<vmem>>, vector<1x224x224xbf16>
    %15 = vector.shape_cast %14 : vector<1x224x224xbf16> to vector<224x224xbf16>
    %16 = vector.shape_cast %13 : vector<224x224xbf16> to vector<1x224x224xbf16>
    tpu.vector_store %arg4[%c1, %c0_10, %c0_11], %16 {strides = array<i32>} : memref<2x224x224xbf16, #tpu.memory_space<vmem>>, vector<1x224x224xbf16>,
    return
  }
  func.func @transform_0(%arg0: i32) -> (i32, i32) {
    %c0_i32 = arith.constant 0 : i32
    %c0_i32_0 = arith.constant 0 : i32
    return %arg0, %c0_i32 : i32, i32
  }
  func.func @transform_1(%arg0: i32) -> (i32, i32) {
    %c0_i32 = arith.constant 0 : i32
    %c0_i32_0 = arith.constant 0 : i32
    %c0_i32_1 = arith.constant 0 : i32
    return %c0_i32, %c0_i32_0 : i32, i32
  }
  func.func @transform_2(%arg0: i32) -> (i32, i32) {
    %c0_i32 = arith.constant 0 : i32
    %c0_i32_0 = arith.constant 0 : i32
    %c0_i32_1 = arith.constant 0 : i32
    return %c0_i32, %c0_i32_0 : i32, i32
  }
  func.func @transform_3(%arg0: i32) -> (i32, i32, i32) {
    %c0_i32 = arith.constant 0 : i32
    %c0_i32_0 = arith.constant 0 : i32
    %c0_i32_1 = arith.constant 0 : i32
    return %arg0, %c0_i32, %c0_i32_0 : i32, i32, i32
  }
}

</mosaic_0001>

<bundles_post_ra>
// kernel: tpu_custom_call.1
= control target key start
LH: loop header
LB: loop body
LE: loop exit
PB: predicated region body
PF: predicated region fallthrough
CT: control target
= control target key end

     0   :  { %8 = vsyncpa [#allocation3], 0  ;;  %s1960_s0 = inlined_call_operand.vmem [shape: bf16[64,16], index: 0, kind: input, shape index: {}]   ;;  %s1961_s1 = inlined_call_operand.vmem [shape: bf16[224,16], index: 1, kind: input, shape index: {}]   ;;  %s1962_s2 = inlined_call_operand.vmem [shape: bf16[16,224], index: 2, kind: input, shape index: {}]   ;;  %s1963_s3 = inlined_call_operand.hbm [shape: bf16[4,224,224], index: 3, kind: output, shape index: {}]  }
   0x1   :  { %10 = vsyncpa [#allocation3 + $0x1], 0  ;;  %s1572_s12 = smov 0   ;;  %s1574_s13 = smov 0  }
   0x2   :  { %s1576_s14 = smov 0   ;;  %s1578_s15 = smov 0  }
   0x3 LB: > { %s1593_s16 = sadd.s32 4294967295, %s1546_s15   ;;  %s1222_s17 = sadd.s32 4294967294, %s1546_s15   ;;  %s1546_s15 = sphi %s1578_s15, %s1971_s15   ;;  %s1542_s14 = sphi %s1576_s14, %s1970_s14   ;;  %s1538_s13 = sphi %s1574_s13, %s1969_s13   ;;  %s1534_s12 = sphi %s1572_s12, %s1968_s12  }
   0x4   : > { %s1597_s18 = sadd.s32 1, %s1546_s15   ;;  %s91_s19 = sadd.s32 1, %s1542_s14 }
   0x5   : > { %s88_s20 = ssub.s32 %s1546_s15, %s1597_s18  ;;  %p101_p0 = scmp.ne.s32.totalorder %s1542_s14, %s1538_s13 }
   0x6   : > { %p89_p1 = scmp.eq.s32.totalorder %s88_s20, 0  ;;  %p102_p2 = scmp.eq.s32.totalorder %s1593_s16, 1 }
   0x7   : > { %p107_p3 = scmp.ne.s32.totalorder %s1538_s13, %s1534_s12  ;;  %p108_p4 = scmp.eq.s32.totalorder %s1222_s17, 1 }
   0x8   : > { %s1608_s21 = scalar_select %p89_p1, %s1542_s14, %s91_s19  }
   0x9   : > { %p1610_p5 = por %p102_p2, %p101_p0  ;;  %p1614_p6 = por %p108_p4, %p107_p3 }
   0xa   : > { %p1225_p7 = scmp.ge.s32.totalorder %s1546_s15, 1  ;;  %p141_p8 = scmp.lt.s32.totalorder %s1546_s15, 3 }
   0xc   : > { %p142_p9 = pnand %p1225_p7, %p141_p8 }
   0xd   : > { %s1226_s26 = sshll.u32 (!%p142_p9), %s1593_s16, 2  ;;  %s162_s25 = sand.u32 (!%p142_p9), 1, %s1538_s13  }
   0xe   : > { %145 = sbr.rel (%p142_p9) target bundleno = 549 (0x225), region = 32  ;;  %p166_p10 = scmp.lt.s32.totalorder (!%p142_p9), %s1226_s26, 7 }
   0xf   : > { %s1424_s28 = smul.u32 (!%p142_p9), 7168, %s1593_s16  ;;  %s1920_s16 = scalar_lea.sflag (!%p142_p9), [#allocation3], %s162_s25 }
  0x10   : > { %s1549_s7 = smov (!%p142_p9), [#allocation2]  }
  0x11   : > { %s1490_s8 = sshll.u32 (!%p142_p9), %s1549_s7, 4  ;;  %s1491_s8 = int_to_ptr.vmem [resolvable:$false] %s1490_s8 }
  0x12   : > { %s1492_s9 = scalar_lea.vmem (!%p142_p9), %s1491_s8, 14336 }
  0x13   : > { %v1467_v0 = vld [vmem:[%s1962_s2 + $0x4] ss:$8 sps:$4 sm:$0xff]   ;;  %v1469_v1 = vld [vmem:[%s1962_s2] ss:$8 sps:$4 sm:$0xff]   ;;  %v1548_v2 = vmov 0   ;;  %s1973_s26 = smov (!%p166_p10, %s1226_s26), 7 }
  0x14   : > { %238 = vmatprep.mubr.bf16.mxu0 %v1548_v2  ;;  %248 = vmatprep.mubr.bf16.mxu1 %v1548_v2  ;;  %s1227_s29 = sshll.u32 %s1973_s26, 2  ;;  %vm199_vm0 = vcmask 130048   ;;  %v1472_v17 = vld [vmem:[%s1961_s1] sm:$0xff]   ;;  %v1473_v18 = vld [vmem:[%s1961_s1 + $0x8] sm:$0xff]   ;;  %v1474_v19 = vld [vmem:[%s1961_s1 + $0x10] sm:$0xff]   ;;  %s1423_s26 = smul.u32 448, %s162_s25 }
  0x15   : > { %220 = vmatprep.subr.bf16.mxu0 %v1467_v0  ;;  %1421 = vmatprep.subr.bf16.mxu1 %v1467_v0  ;;  %s169_s5 = scalar_lea.vmem %s1960_s0, %s1227_s29  ;;  %v1475_v20 = vld [vmem:[%s1961_s1 + $0x18] sm:$0xff]   ;;  %v1476_v21 = vld [vmem:[%s1961_s1 + $0x20] sm:$0xff]   ;;  %v1477_v22 = vld [vmem:[%s1961_s1 + $0x28] sm:$0xff]   ;;  %vm744_vm1 = vcmask 1043456   ;;  %vm745_vm2 = vcmask 785412  }
  0x16   : > { %221 = vmatpush1.bf16.msra.mxu0 %v1469_v1  ;;  %1422 = vmatpush1.bf16.msra.mxu1 %v1469_v1  ;;  %v1470_v3 = vld [vmem:[%s169_s5] sm:$0xff]   ;;  %v1471_v4 = vld [vmem:[%s169_s5 + $0x8] sm:$0xff]   ;;  %v1478_v23 = vld [vmem:[%s1961_s1 + $0x30] sm:$0xff]   ;;  %s1739_s27 = scalar_lea.vmem [#allocation2], %s1423_s26  ;;  %s1908_s5 = scalar_lea.hbm %s1963_s3, %s1424_s28 }
  0x17   : > { %v1479_v24 = vld [vmem:[%s1961_s1 + $0x38] sm:$0xff]   ;;  %v1480_v25 = vld [vmem:[%s1961_s1 + $0x40] sm:$0xff]   ;;  %v1481_v26 = vld [vmem:[%s1961_s1 + $0x48] sm:$0xff]   ;;  %s1160_s29 = sshll.u32 %s1739_s27, 4  ;;  %s1910_s29 = int_to_ptr.vmem [resolvable:$true] %s1160_s29 }
  0x18   : > { %v1482_v27 = vld [vmem:[%s1961_s1 + $0x50] sm:$0xff]   ;;  %v1483_v28 = vld [vmem:[%s1961_s1 + $0x58] sm:$0xff]   ;;  %v1484_v29 = vld [vmem:[%s1961_s1 + $0x60] sm:$0xff]   ;;  %s1486_s6 = scalar_lea.vmem %s1910_s29, 7168  ;;  %p1493_p0 = scmp.lt.s32.totalorder %s1910_s29, %s1491_s8 }
  0x19   : > { %1232 = vmatmul.mubr.msk.bf16.vlgmr.msra.gmra.mxu0 %vm199_vm0, %v1470_v3  ;;  %1233 = vmatmul.mubr.msk.bf16.vlgmr.msra.gmra.mxu1 %vm199_vm0, %v1471_v4  ;;  %v1485_v30 = vld [vmem:[%s1961_s1 + $0x68] sm:$0xff]   ;;  %vm1735_vm3 = vmor %vm745_vm2, %vm744_vm1  ;;  %p1487_p11 = scmp.ne.s32.totalorder %s1910_s29, %s1486_s6  ;;  %p1494_p1 = scmp.lt.s32.totalorder %s1492_s9, %s1486_s6 }
  0x1a   : > { %807 = vmatprep.mubr.bf16.mxu0 %v1548_v2  ;;  %435 = vmatprep.mubr.bf16.mxu1 %v1548_v2 }
  0x1b   : > { %p1488_p12 = pnand %p1487_p11, %p1610_p5  ;;  %p1495_p2 = por %p1494_p1, %p1493_p0 }
  0x1d   : > { %p1489_p13 = pneg %p1488_p12 }
  0x1f   : > { %p1496_p3 = pnand %p1495_p2, %p1489_p13 }
  0xd9   : > { %v240_v5 = vpop.f32.mrf.mxu0  ;;  %v250_v6 = vpop.f32.mrf.mxu1 }
  0xdb   : > { %v242_v7 = vpop.f32.mrf.mxu0  ;;  %v252_v8 = vpop.f32.mrf.mxu1 }
  0xdd   : > { %v244_v9 = vpop.f32.mrf.mxu0  ;;  %v254_v10 = vpop.f32.mrf.mxu1 }
  0xde   : > { %v259_v14 = vpack.c.bf16 %v244_v9, %v240_v5  ;;  %v261_v16 = vpack.c.bf16 %v254_v10, %v250_v6 }
  0xdf   : > { %v246_v11 = vpop.f32.mrf.mxu0  ;;  %v256_v13 = vpop.f32.mrf.mxu1 }
  0xe0   : > { %v260_v12 = vpack.c.bf16 %v246_v11, %v242_v7  ;;  %v262_v15 = vpack.c.bf16 %v256_v13, %v252_v8 }
  0xe2   : > { %417 = vmatprep.subr.bf16.mxu1 %v260_v12  ;;  %789 = vmatprep.subr.bf16.mxu0 %v262_v15 }
  0xe3   : > { %418 = vmatpush1.bf16.msra.mxu1 %v259_v14  ;;  %790 = vmatpush1.bf16.msra.mxu0 %v261_v16 }
  0xe6   : > { %1248 = vmatmul.mubr.msk.bf16.vlgmr.msra.gmra.mxu1 %vm199_vm0, %v1472_v17  ;;  %1290 = vmatmul.mubr.msk.bf16.vlgmr.msra.gmra.mxu0 %vm199_vm0, %v1472_v17 }
  0xe7   : > { %445 = vmatprep.mubr.bf16.mxu1 %v1548_v2  ;;  %817 = vmatprep.mubr.bf16.mxu0 %v1548_v2 }
  0xee   : > { %1249 = vmatmul.mubr.msk.bf16.gmra.mxu1 %vm199_vm0, %v1473_v18  ;;  %1291 = vmatmul.mubr.msk.bf16.gmra.mxu0 %vm199_vm0, %v1473_v18 }
  0xef   : > { %455 = vmatprep.mubr.bf16.mxu1 %v1548_v2  ;;  %827 = vmatprep.mubr.bf16.mxu0 %v1548_v2 }
  0xf6   : > { %1250 = vmatmul.mubr.msk.bf16.gmra.mxu1 %vm199_vm0, %v1474_v19  ;;  %1292 = vmatmul.mubr.msk.bf16.gmra.mxu0 %vm199_vm0, %v1474_v19 }
  0xf7   : > { %465 = vmatprep.mubr.bf16.mxu1 %v1548_v2  ;;  %837 = vmatprep.mubr.bf16.mxu0 %v1548_v2 }
  0xfe   : > { %1251 = vmatmul.mubr.msk.bf16.gmra.mxu1 %vm199_vm0, %v1475_v20  ;;  %1293 = vmatmul.mubr.msk.bf16.gmra.mxu0 %vm199_vm0, %v1475_v20 }
  0xff   : > { %475 = vmatprep.mubr.bf16.mxu1 %v1548_v2  ;;  %847 = vmatprep.mubr.bf16.mxu0 %v1548_v2 }
 0x106   : > { %1252 = vmatmul.mubr.msk.bf16.gmra.mxu1 %vm199_vm0, %v1476_v21  ;;  %1294 = vmatmul.mubr.msk.bf16.gmra.mxu0 %vm199_vm0, %v1476_v21 }
 0x107   : > { %485 = vmatprep.mubr.bf16.mxu1 %v1548_v2  ;;  %857 = vmatprep.mubr.bf16.mxu0 %v1548_v2 }
 0x10e   : > { %1253 = vmatmul.mubr.msk.bf16.gmra.mxu1 %vm199_vm0, %v1477_v22  ;;  %1295 = vmatmul.mubr.msk.bf16.gmra.mxu0 %vm199_vm0, %v1477_v22 }
 0x10f   : > { %495 = vmatprep.mubr.bf16.mxu1 %v1548_v2  ;;  %867 = vmatprep.mubr.bf16.mxu0 %v1548_v2 }
 0x116   : > { %1254 = vmatmul.mubr.msk.bf16.gmra.mxu1 %vm199_vm0, %v1478_v23  ;;  %1296 = vmatmul.mubr.msk.bf16.gmra.mxu0 %vm199_vm0, %v1478_v23 }
 0x117   : > { %505 = vmatprep.mubr.bf16.mxu1 %v1548_v2  ;;  %877 = vmatprep.mubr.bf16.mxu0 %v1548_v2 }
 0x11e   : > { %1255 = vmatmul.mubr.msk.bf16.gmra.mxu1 %vm199_vm0, %v1479_v24  ;;  %1297 = vmatmul.mubr.msk.bf16.gmra.mxu0 %vm199_vm0, %v1479_v24 }
 0x11f   : > { %515 = vmatprep.mubr.bf16.mxu1 %v1548_v2  ;;  %887 = vmatprep.mubr.bf16.mxu0 %v1548_v2 }
 0x126   : > { %1256 = vmatmul.mubr.msk.bf16.gmra.mxu1 %vm199_vm0, %v1480_v25  ;;  %1298 = vmatmul.mubr.msk.bf16.gmra.mxu0 %vm199_vm0, %v1480_v25 }
 0x127   : > { %525 = vmatprep.mubr.bf16.mxu1 %v1548_v2  ;;  %897 = vmatprep.mubr.bf16.mxu0 %v1548_v2 }
 0x12e   : > { %1257 = vmatmul.mubr.msk.bf16.gmra.mxu1 %vm199_vm0, %v1481_v26  ;;  %1299 = vmatmul.mubr.msk.bf16.gmra.mxu0 %vm199_vm0, %v1481_v26 }
 0x12f   : > { %535 = vmatprep.mubr.bf16.mxu1 %v1548_v2  ;;  %907 = vmatprep.mubr.bf16.mxu0 %v1548_v2 }
 0x136   : > { %1258 = vmatmul.mubr.msk.bf16.gmra.mxu1 %vm199_vm0, %v1482_v27  ;;  %1300 = vmatmul.mubr.msk.bf16.gmra.mxu0 %vm199_vm0, %v1482_v27 }
 0x137   : > { %545 = vmatprep.mubr.bf16.mxu1 %v1548_v2  ;;  %917 = vmatprep.mubr.bf16.mxu0 %v1548_v2 }
 0x13e   : > { %1259 = vmatmul.mubr.msk.bf16.gmra.mxu1 %vm199_vm0, %v1483_v28  ;;  %1301 = vmatmul.mubr.msk.bf16.gmra.mxu0 %vm199_vm0, %v1483_v28 }
 0x13f   : > { %555 = vmatprep.mubr.bf16.mxu1 %v1548_v2  ;;  %927 = vmatprep.mubr.bf16.mxu0 %v1548_v2 }
 0x146   : > { %1260 = vmatmul.mubr.msk.bf16.gmra.mxu1 %vm199_vm0, %v1484_v29  ;;  %1302 = vmatmul.mubr.msk.bf16.gmra.mxu0 %vm199_vm0, %v1484_v29 }
 0x147   : > { %565 = vmatprep.mubr.bf16.mxu1 %v1548_v2  ;;  %937 = vmatprep.mubr.bf16.mxu0 %v1548_v2 }
 0x14e   : > { %1261 = vmatmul.mubr.msk.bf16.gmra.mxu1 %vm199_vm0, %v1485_v30  ;;  %1303 = vmatmul.mubr.msk.bf16.gmra.mxu0 %vm199_vm0, %v1485_v30 }
 0x1a6   : > { %v437_v31 = vpop.f32.mrf.mxu1  ;;  %v809_v32 = vpop.f32.mrf.mxu0 }
 0x1a8   : > { %v439_v33 = vpop.f32.mrf.mxu1  ;;  %v811_v36 = vpop.f32.mrf.mxu0 }
 0x1a9   : > { %v1365_v35 = vpack.c.bf16 %v439_v33, %v437_v31  ;;  %v1393_v37 = vpack.c.bf16 %v811_v36, %v809_v32 }
 0x1aa   : > { %v441_v38 = vpop.f32.mrf.mxu1  ;;  %v813_v39 = vpop.f32.mrf.mxu0 }
 0x1ab   : > { %747 = vst.msk [vmem:[%s1739_s27] sm:$0xff] %vm1735_vm3, %v1365_v35  ;;  %1332 = vst.msk [vmem:[%s1739_s27 + $0xe0] sm:$0xff] %vm1735_vm3, %v1393_v37 }
 0x1ac   : > { %v443_v40 = vpop.f32.mrf.mxu1  ;;  %v815_v42 = vpop.f32.mrf.mxu0 }
 0x1ad   : > { %v1366_v41 = vpack.c.bf16 %v443_v40, %v441_v38  ;;  %v1394_v43 = vpack.c.bf16 %v815_v42, %v813_v39 }
 0x1ae   : > { %v447_v44 = vpop.f32.mrf.mxu1  ;;  %v819_v45 = vpop.f32.mrf.mxu0 }
 0x1af   : > { %748 = vst.msk [vmem:[%s1739_s27 + $0x8] sm:$0xff] %vm1735_vm3, %v1366_v41  ;;  %1333 = vst.msk [vmem:[%s1739_s27 + $0xe8] sm:$0xff] %vm1735_vm3, %v1394_v43 }
 0x1b0   : > { %v449_v46 = vpop.f32.mrf.mxu1  ;;  %v821_v48 = vpop.f32.mrf.mxu0 }
 0x1b1   : > { %v1367_v47 = vpack.c.bf16 %v449_v46, %v447_v44  ;;  %v1395_v49 = vpack.c.bf16 %v821_v48, %v819_v45 }
 0x1b2   : > { %v451_v50 = vpop.f32.mrf.mxu1  ;;  %v823_v51 = vpop.f32.mrf.mxu0 }
 0x1b3   : > { %749 = vst.msk [vmem:[%s1739_s27 + $0x10] sm:$0xff] %vm1735_vm3, %v1367_v47  ;;  %1334 = vst.msk [vmem:[%s1739_s27 + $0xf0] sm:$0xff] %vm1735_vm3, %v1395_v49 }
 0x1b4   : > { %v453_v52 = vpop.f32.mrf.mxu1  ;;  %v825_v54 = vpop.f32.mrf.mxu0 }
 0x1b5   : > { %v1368_v53 = vpack.c.bf16 %v453_v52, %v451_v50  ;;  %v1396_v55 = vpack.c.bf16 %v825_v54, %v823_v51 }
 0x1b6   : > { %v457_v56 = vpop.f32.mrf.mxu1  ;;  %v829_v57 = vpop.f32.mrf.mxu0 }
 0x1b7   : > { %750 = vst.msk [vmem:[%s1739_s27 + $0x18] sm:$0xff] %vm1735_vm3, %v1368_v53  ;;  %1335 = vst.msk [vmem:[%s1739_s27 + $0xf8] sm:$0xff] %vm1735_vm3, %v1396_v55 }
 0x1b8   : > { %v459_v58 = vpop.f32.mrf.mxu1  ;;  %v831_v60 = vpop.f32.mrf.mxu0 }
 0x1b9   : > { %v1369_v59 = vpack.c.bf16 %v459_v58, %v457_v56  ;;  %v1397_v61 = vpack.c.bf16 %v831_v60, %v829_v57 }
 0x1ba   : > { %v461_v62 = vpop.f32.mrf.mxu1  ;;  %v833_v63 = vpop.f32.mrf.mxu0 }
 0x1bb   : > { %751 = vst.msk [vmem:[%s1739_s27 + $0x20] sm:$0xff] %vm1735_vm3, %v1369_v59  ;;  %1336 = vst.msk [vmem:[%s1739_s27 + $0x100] sm:$0xff] %vm1735_vm3, %v1397_v61 }
 0x1bc   : > { %v463_v0 = vpop.f32.mrf.mxu1  ;;  %v835_v2 = vpop.f32.mrf.mxu0 }
 0x1bd   : > { %v1370_v1 = vpack.c.bf16 %v463_v0, %v461_v62  ;;  %v1398_v3 = vpack.c.bf16 %v835_v2, %v833_v63 }
 0x1be   : > { %v467_v4 = vpop.f32.mrf.mxu1  ;;  %v839_v5 = vpop.f32.mrf.mxu0 }
 0x1bf   : > { %752 = vst.msk [vmem:[%s1739_s27 + $0x28] sm:$0xff] %vm1735_vm3, %v1370_v1  ;;  %1337 = vst.msk [vmem:[%s1739_s27 + $0x108] sm:$0xff] %vm1735_vm3, %v1398_v3 }
 0x1c0   : > { %v469_v6 = vpop.f32.mrf.mxu1  ;;  %v841_v8 = vpop.f32.mrf.mxu0 }
 0x1c1   : > { %v1371_v7 = vpack.c.bf16 %v469_v6, %v467_v4  ;;  %v1399_v9 = vpack.c.bf16 %v841_v8, %v839_v5 }
 0x1c2   : > { %v471_v10 = vpop.f32.mrf.mxu1  ;;  %v843_v11 = vpop.f32.mrf.mxu0 }
 0x1c3   : > { %753 = vst.msk [vmem:[%s1739_s27 + $0x30] sm:$0xff] %vm1735_vm3, %v1371_v7  ;;  %1338 = vst.msk [vmem:[%s1739_s27 + $0x110] sm:$0xff] %vm1735_vm3, %v1399_v9 }
 0x1c4   : > { %v473_v12 = vpop.f32.mrf.mxu1  ;;  %v845_v14 = vpop.f32.mrf.mxu0 }
 0x1c5   : > { %v1372_v13 = vpack.c.bf16 %v473_v12, %v471_v10  ;;  %v1400_v15 = vpack.c.bf16 %v845_v14, %v843_v11 }
 0x1c6   : > { %v477_v16 = vpop.f32.mrf.mxu1  ;;  %v849_v17 = vpop.f32.mrf.mxu0 }
 0x1c7   : > { %754 = vst.msk [vmem:[%s1739_s27 + $0x38] sm:$0xff] %vm1735_vm3, %v1372_v13  ;;  %1339 = vst.msk [vmem:[%s1739_s27 + $0x118] sm:$0xff] %vm1735_vm3, %v1400_v15 }
 0x1c8   : > { %v479_v18 = vpop.f32.mrf.mxu1  ;;  %v851_v20 = vpop.f32.mrf.mxu0 }
 0x1c9   : > { %v1373_v19 = vpack.c.bf16 %v479_v18, %v477_v16  ;;  %v1401_v21 = vpack.c.bf16 %v851_v20, %v849_v17 }
 0x1ca   : > { %v481_v22 = vpop.f32.mrf.mxu1  ;;  %v853_v23 = vpop.f32.mrf.mxu0 }
 0x1cb   : > { %755 = vst.msk [vmem:[%s1739_s27 + $0x40] sm:$0xff] %vm1735_vm3, %v1373_v19  ;;  %1340 = vst.msk [vmem:[%s1739_s27 + $0x120] sm:$0xff] %vm1735_vm3, %v1401_v21 }
 0x1cc   : > { %v483_v24 = vpop.f32.mrf.mxu1  ;;  %v855_v26 = vpop.f32.mrf.mxu0 }
 0x1cd   : > { %v1374_v25 = vpack.c.bf16 %v483_v24, %v481_v22  ;;  %v1402_v27 = vpack.c.bf16 %v855_v26, %v853_v23 }
 0x1ce   : > { %v487_v28 = vpop.f32.mrf.mxu1  ;;  %v859_v29 = vpop.f32.mrf.mxu0 }
 0x1cf   : > { %756 = vst.msk [vmem:[%s1739_s27 + $0x48] sm:$0xff] %vm1735_vm3, %v1374_v25  ;;  %1341 = vst.msk [vmem:[%s1739_s27 + $0x128] sm:$0xff] %vm1735_vm3, %v1402_v27 }
 0x1d0   : > { %v489_v30 = vpop.f32.mrf.mxu1  ;;  %v861_v32 = vpop.f32.mrf.mxu0 }
 0x1d1   : > { %v1375_v31 = vpack.c.bf16 %v489_v30, %v487_v28  ;;  %v1403_v33 = vpack.c.bf16 %v861_v32, %v859_v29 }
 0x1d2   : > { %v491_v35 = vpop.f32.mrf.mxu1  ;;  %v863_v36 = vpop.f32.mrf.mxu0 }
 0x1d3   : > { %757 = vst.msk [vmem:[%s1739_s27 + $0x50] sm:$0xff] %vm1735_vm3, %v1375_v31  ;;  %1342 = vst.msk [vmem:[%s1739_s27 + $0x130] sm:$0xff] %vm1735_vm3, %v1403_v33 }
 0x1d4   : > { %v493_v37 = vpop.f32.mrf.mxu1  ;;  %v865_v39 = vpop.f32.mrf.mxu0 }
 0x1d5   : > { %v1376_v38 = vpack.c.bf16 %v493_v37, %v491_v35  ;;  %v1404_v40 = vpack.c.bf16 %v865_v39, %v863_v36 }
 0x1d6   : > { %v497_v41 = vpop.f32.mrf.mxu1  ;;  %v869_v42 = vpop.f32.mrf.mxu0 }
 0x1d7   : > { %758 = vst.msk [vmem:[%s1739_s27 + $0x58] sm:$0xff] %vm1735_vm3, %v1376_v38  ;;  %1343 = vst.msk [vmem:[%s1739_s27 + $0x138] sm:$0xff] %vm1735_vm3, %v1404_v40 }
 0x1d8   : > { %v499_v43 = vpop.f32.mrf.mxu1  ;;  %v871_v45 = vpop.f32.mrf.mxu0 }
 0x1d9   : > { %v1377_v44 = vpack.c.bf16 %v499_v43, %v497_v41  ;;  %v1405_v46 = vpack.c.bf16 %v871_v45, %v869_v42 }
 0x1da   : > { %v501_v47 = vpop.f32.mrf.mxu1  ;;  %v873_v48 = vpop.f32.mrf.mxu0 }
 0x1db   : > { %759 = vst.msk [vmem:[%s1739_s27 + $0x60] sm:$0xff] %vm1735_vm3, %v1377_v44  ;;  %1344 = vst.msk [vmem:[%s1739_s27 + $0x140] sm:$0xff] %vm1735_vm3, %v1405_v46 }
 0x1dc   : > { %v503_v49 = vpop.f32.mrf.mxu1  ;;  %v875_v51 = vpop.f32.mrf.mxu0 }
 0x1dd   : > { %v1378_v50 = vpack.c.bf16 %v503_v49, %v501_v47  ;;  %v1406_v52 = vpack.c.bf16 %v875_v51, %v873_v48 }
 0x1de   : > { %v507_v53 = vpop.f32.mrf.mxu1  ;;  %v879_v54 = vpop.f32.mrf.mxu0 }
 0x1df   : > { %760 = vst.msk [vmem:[%s1739_s27 + $0x68] sm:$0xff] %vm1735_vm3, %v1378_v50  ;;  %1345 = vst.msk [vmem:[%s1739_s27 + $0x148] sm:$0xff] %vm1735_vm3, %v1406_v52 }
 0x1e0   : > { %v509_v55 = vpop.f32.mrf.mxu1  ;;  %v881_v57 = vpop.f32.mrf.mxu0 }
 0x1e1   : > { %v1379_v56 = vpack.c.bf16 %v509_v55, %v507_v53  ;;  %v1407_v58 = vpack.c.bf16 %v881_v57, %v879_v54 }
 0x1e2   : > { %v511_v59 = vpop.f32.mrf.mxu1  ;;  %v883_v60 = vpop.f32.mrf.mxu0 }
 0x1e3   : > { %761 = vst.msk [vmem:[%s1739_s27 + $0x70] sm:$0xff] %vm1735_vm3, %v1379_v56  ;;  %1346 = vst.msk [vmem:[%s1739_s27 + $0x150] sm:$0xff] %vm1735_vm3, %v1407_v58 }
 0x1e4   : > { %v513_v61 = vpop.f32.mrf.mxu1  ;;  %v885_v63 = vpop.f32.mrf.mxu0 }
 0x1e5   : > { %v1380_v62 = vpack.c.bf16 %v513_v61, %v511_v59  ;;  %v1408_v0 = vpack.c.bf16 %v885_v63, %v883_v60 }
 0x1e6   : > { %v517_v1 = vpop.f32.mrf.mxu1  ;;  %v889_v2 = vpop.f32.mrf.mxu0 }
 0x1e7   : > { %762 = vst.msk [vmem:[%s1739_s27 + $0x78] sm:$0xff] %vm1735_vm3, %v1380_v62  ;;  %1347 = vst.msk [vmem:[%s1739_s27 + $0x158] sm:$0xff] %vm1735_vm3, %v1408_v0 }
 0x1e8   : > { %v519_v3 = vpop.f32.mrf.mxu1  ;;  %v891_v5 = vpop.f32.mrf.mxu0 }
 0x1e9   : > { %v1381_v4 = vpack.c.bf16 %v519_v3, %v517_v1  ;;  %v1409_v6 = vpack.c.bf16 %v891_v5, %v889_v2 }
 0x1ea   : > { %v521_v7 = vpop.f32.mrf.mxu1  ;;  %v893_v8 = vpop.f32.mrf.mxu0 }
 0x1eb   : > { %763 = vst.msk [vmem:[%s1739_s27 + $0x80] sm:$0xff] %vm1735_vm3, %v1381_v4  ;;  %1348 = vst.msk [vmem:[%s1739_s27 + $0x160] sm:$0xff] %vm1735_vm3, %v1409_v6 }
 0x1ec   : > { %v523_v9 = vpop.f32.mrf.mxu1  ;;  %v895_v11 = vpop.f32.mrf.mxu0 }
 0x1ed   : > { %v1382_v10 = vpack.c.bf16 %v523_v9, %v521_v7  ;;  %v1410_v12 = vpack.c.bf16 %v895_v11, %v893_v8 }
 0x1ee   : > { %v527_v13 = vpop.f32.mrf.mxu1  ;;  %v899_v14 = vpop.f32.mrf.mxu0 }
 0x1ef   : > { %764 = vst.msk [vmem:[%s1739_s27 + $0x88] sm:$0xff] %vm1735_vm3, %v1382_v10  ;;  %1349 = vst.msk [vmem:[%s1739_s27 + $0x168] sm:$0xff] %vm1735_vm3, %v1410_v12 }
 0x1f0   : > { %v529_v15 = vpop.f32.mrf.mxu1  ;;  %v901_v17 = vpop.f32.mrf.mxu0 }
 0x1f1   : > { %v1383_v16 = vpack.c.bf16 %v529_v15, %v527_v13  ;;  %v1411_v18 = vpack.c.bf16 %v901_v17, %v899_v14 }
 0x1f2   : > { %v531_v19 = vpop.f32.mrf.mxu1  ;;  %v903_v20 = vpop.f32.mrf.mxu0 }
 0x1f3   : > { %765 = vst.msk [vmem:[%s1739_s27 + $0x90] sm:$0xff] %vm1735_vm3, %v1383_v16  ;;  %1350 = vst.msk [vmem:[%s1739_s27 + $0x170] sm:$0xff] %vm1735_vm3, %v1411_v18 }
 0x1f4   : > { %v533_v21 = vpop.f32.mrf.mxu1  ;;  %v905_v23 = vpop.f32.mrf.mxu0 }
 0x1f5   : > { %v1384_v22 = vpack.c.bf16 %v533_v21, %v531_v19  ;;  %v1412_v24 = vpack.c.bf16 %v905_v23, %v903_v20 }
 0x1f6   : > { %v537_v25 = vpop.f32.mrf.mxu1  ;;  %v909_v26 = vpop.f32.mrf.mxu0 }
 0x1f7   : > { %766 = vst.msk [vmem:[%s1739_s27 + $0x98] sm:$0xff] %vm1735_vm3, %v1384_v22  ;;  %1351 = vst.msk [vmem:[%s1739_s27 + $0x178] sm:$0xff] %vm1735_vm3, %v1412_v24 }
 0x1f8   : > { %v539_v27 = vpop.f32.mrf.mxu1  ;;  %v911_v29 = vpop.f32.mrf.mxu0 }
 0x1f9   : > { %v1385_v28 = vpack.c.bf16 %v539_v27, %v537_v25  ;;  %v1413_v30 = vpack.c.bf16 %v911_v29, %v909_v26 }
 0x1fa   : > { %v541_v31 = vpop.f32.mrf.mxu1  ;;  %v913_v32 = vpop.f32.mrf.mxu0 }
 0x1fb   : > { %767 = vst.msk [vmem:[%s1739_s27 + $0xa0] sm:$0xff] %vm1735_vm3, %v1385_v28  ;;  %1352 = vst.msk [vmem:[%s1739_s27 + $0x180] sm:$0xff] %vm1735_vm3, %v1413_v30 }
 0x1fc   : > { %v543_v33 = vpop.f32.mrf.mxu1  ;;  %v915_v36 = vpop.f32.mrf.mxu0 }
 0x1fd   : > { %v1386_v35 = vpack.c.bf16 %v543_v33, %v541_v31  ;;  %v1414_v37 = vpack.c.bf16 %v915_v36, %v913_v32 }
 0x1fe   : > { %v547_v38 = vpop.f32.mrf.mxu1  ;;  %v919_v39 = vpop.f32.mrf.mxu0 }
 0x1ff   : > { %768 = vst.msk [vmem:[%s1739_s27 + $0xa8] sm:$0xff] %vm1735_vm3, %v1386_v35  ;;  %1353 = vst.msk [vmem:[%s1739_s27 + $0x188] sm:$0xff] %vm1735_vm3, %v1414_v37 }
 0x200   : > { %v549_v40 = vpop.f32.mrf.mxu1  ;;  %v921_v42 = vpop.f32.mrf.mxu0 }
 0x201   : > { %v1387_v41 = vpack.c.bf16 %v549_v40, %v547_v38  ;;  %v1415_v43 = vpack.c.bf16 %v921_v42, %v919_v39 }
 0x202   : > { %v551_v44 = vpop.f32.mrf.mxu1  ;;  %v923_v45 = vpop.f32.mrf.mxu0 }
 0x203   : > { %769 = vst.msk [vmem:[%s1739_s27 + $0xb0] sm:$0xff] %vm1735_vm3, %v1387_v41  ;;  %1354 = vst.msk [vmem:[%s1739_s27 + $0x190] sm:$0xff] %vm1735_vm3, %v1415_v43 }
 0x204   : > { %v553_v46 = vpop.f32.mrf.mxu1  ;;  %v925_v48 = vpop.f32.mrf.mxu0 }
 0x205   : > { %v1388_v47 = vpack.c.bf16 %v553_v46, %v551_v44  ;;  %v1416_v49 = vpack.c.bf16 %v925_v48, %v923_v45 }
 0x206   : > { %v557_v50 = vpop.f32.mrf.mxu1  ;;  %v929_v51 = vpop.f32.mrf.mxu0 }
 0x207   : > { %770 = vst.msk [vmem:[%s1739_s27 + $0xb8] sm:$0xff] %vm1735_vm3, %v1388_v47  ;;  %1355 = vst.msk [vmem:[%s1739_s27 + $0x198] sm:$0xff] %vm1735_vm3, %v1416_v49 }
 0x208   : > { %v559_v52 = vpop.f32.mrf.mxu1  ;;  %v931_v54 = vpop.f32.mrf.mxu0 }
 0x209   : > { %v1389_v53 = vpack.c.bf16 %v559_v52, %v557_v50  ;;  %v1417_v55 = vpack.c.bf16 %v931_v54, %v929_v51 }
 0x20a   : > { %v561_v56 = vpop.f32.mrf.mxu1  ;;  %v933_v57 = vpop.f32.mrf.mxu0 }
 0x20b   : > { %771 = vst.msk [vmem:[%s1739_s27 + $0xc0] sm:$0xff] %vm1735_vm3, %v1389_v53  ;;  %1356 = vst.msk [vmem:[%s1739_s27 + $0x1a0] sm:$0xff] %vm1735_vm3, %v1417_v55 }
 0x20c   : > { %v563_v58 = vpop.f32.mrf.mxu1  ;;  %v935_v60 = vpop.f32.mrf.mxu0 }
 0x20d   : > { %v1390_v59 = vpack.c.bf16 %v563_v58, %v561_v56  ;;  %v1418_v61 = vpack.c.bf16 %v935_v60, %v933_v57 }
 0x20e   : > { %v567_v62 = vpop.f32.mrf.mxu1  ;;  %v939_v63 = vpop.f32.mrf.mxu0 }
 0x20f   : > { %772 = vst.msk [vmem:[%s1739_s27 + $0xc8] sm:$0xff] %vm1735_vm3, %v1390_v59  ;;  %1357 = vst.msk [vmem:[%s1739_s27 + $0x1a8] sm:$0xff] %vm1735_vm3, %v1418_v61 }
 0x210   : > { %v569_v0 = vpop.f32.mrf.mxu1  ;;  %v941_v2 = vpop.f32.mrf.mxu0 }
 0x211   : > { %v1391_v1 = vpack.c.bf16 %v569_v0, %v567_v62  ;;  %v1419_v3 = vpack.c.bf16 %v941_v2, %v939_v63 }
 0x212   : > { %v571_v4 = vpop.f32.mrf.mxu1  ;;  %v943_v5 = vpop.f32.mrf.mxu0 }
 0x213   : > { %773 = vst.msk [vmem:[%s1739_s27 + $0xd0] sm:$0xff] %vm1735_vm3, %v1391_v1  ;;  %1358 = vst.msk [vmem:[%s1739_s27 + $0x1b0] sm:$0xff] %vm1735_vm3, %v1419_v3 }
 0x214   : > { %v573_v6 = vpop.f32.mrf.mxu1  ;;  %v945_v8 = vpop.f32.mrf.mxu0 }
 0x215   : > { %v1392_v7 = vpack.c.bf16 %v573_v6, %v571_v4  ;;  %v1420_v9 = vpack.c.bf16 %v945_v8, %v943_v5 }
 0x217   : > { %774 = vst.msk [vmem:[%s1739_s27 + $0xd8] sm:$0xff] %vm1735_vm3, %v1392_v7  ;;  %1359 = vst.msk [vmem:[%s1739_s27 + $0x1b8] sm:$0xff] %vm1735_vm3, %v1420_v9 }
 0x218   : > { %1499 = shalt.err (!%p1496_p3)
}
 0x219   : > { %s1500_s10 = scalar_lea.hbm %s1908_s5, 7168  ;;  %s1504_s19 = scalar_lea.hbm %s1963_s3, 14336 }
 0x21a   : > { %p1501_p4 = scmp.ne.s32.totalorder %s1908_s5, %s1500_s10  ;;  %p1505_p9 = scmp.lt.s32.totalorder %s1908_s5, %s1963_s3 }
 0x21b   : > { %p1506_p10 = scmp.lt.s32.totalorder %s1504_s19, %s1500_s10 }
 0x21c   : > { %p1502_p7 = pnand %p1501_p4, %p1610_p5 }
 0x21d   : > { %p1507_p11 = por %p1506_p10, %p1505_p9 }
 0x21e   : > { %p1503_p8 = pneg %p1502_p7 }
 0x220   : > { %p1508_p12 = pnand %p1507_p11, %p1503_p8 }
 0x222   : > { %1511 = shalt.err (!%p1508_p12)
}
 0x223   : > { %s1550_s25 = smov 128   ;;  %s1551_s26 = smov 8  }
 0x224   : > { %1425 = dma.vmem_to_hbm [thread:$0]  (%p1610_p5), %s1910_s29, 7168, %s1908_s5, %s1920_s16, %s1550_s25, %s1550_s25, %s1551_s26  }
 0x225 PF: > { %p1431_p13 = scmp.ge.s32.totalorder %s1546_s15, 2  ;;  %s1175_s27 = sand.u32 1, %s1534_s12  }
 0x226   : > { %s1176_s28 = scalar_lea.sflag [#allocation3], %s1175_s27 }
 0x227   : > { %p1428_p0 = pnand %p1431_p13, %p1614_p6 }
 0x229   : > { %p1429_p1 = pneg %p1428_p0 }
 0x22b   : > { %1529 = dma.done.wait (%p1429_p1), %s1176_s28, 7168  }
 0x22c   : > { %1531 = vsyncadd (%p1429_p1), %s1176_s28, 4294960128  ;;  %p13_p2 = scmp.ge.s32.totalorder %s1597_s18, 4   ;;  %s1968_s12 = smov %s1538_s13 }
 0x22d   : > { %s1969_s13 = smov %s1542_s14  ;;  %s1970_s14 = smov %s1608_s21 }
 0x22e   : > { %s1971_s15 = smov %s1597_s18  ;;  %15 = sbr.rel (!%p13_p2) target bundleno = 3 (0x3), region = 68 }
 0x233   :  { %1181 = vsyncpa [#allocation3], 1 }
 0x234   :  { %1183 = vsyncpa [#allocation3 + $0x1], 1 }

</bundles_post_ra>
